<compile_context>
chip_gen: v7x
topology: tpu7x:2x2x1
jax: 0.10.0
libtpu: 0.0.40
codegen_flags: <defaults>
</compile_context>

<pallas_src>
import functools

import jax
import jax.numpy as jnp
from jax.experimental import pallas as pl
from jax.experimental.pallas import tpu as pltpu


LANE = 128  # TPU lane width; hidden dim padded to a multiple of this.


def _round_up(n, m):
    return ((n + m - 1) // m) * m


def mlp_kernel(x_ref, w1_ref, b1_ref, w2_ref, b2_ref, o_ref):
    # fc1 (MXU, f32 accumulate) + bias + ReLU (VPU, f32, lane-dense: 128 cols)
    h = jnp.dot(x_ref[...], w1_ref[...], preferred_element_type=jnp.float32)
    h = jnp.maximum(h + b1_ref[...], 0.0)
    # fc2 (MXU, f32 accumulate) + bias; output kept at its true width (2).
    h = h.astype(w2_ref.dtype)
    out = jnp.dot(h, w2_ref[...], preferred_element_type=jnp.float32)
    out = out + b2_ref[...]
    o_ref[...] = out.astype(o_ref.dtype)


def prepare_simples_params(w1, b1, w2, b2, *, compute_dtype=None):
    """One-time parameter prep (hoisted out of the per-call path).

    w1: (in, hidden)   fc1 weight (transposed from PyTorch's (out, in))
    b1: (hidden,)
    w2: (hidden, out)  fc2 weight (transposed)
    b2: (out,)

    Pads only the hidden dim to a lane-aligned width (100 -> 128) with zeros
    (relu(0)=0 and zero w2 rows keep results exact).  Output width stays 2.
    Optionally casts w1/w2 to compute_dtype (e.g. bf16); biases stay f32.
    """
    hidden = w1.shape[1]
    H = _round_up(hidden, LANE)  # 100 -> 128

    w1_p = jnp.pad(w1, ((0, 0), (0, H - hidden)))
    b1_p = jnp.pad(b1, (0, H - hidden)).reshape(1, H)
    w2_p = jnp.pad(w2, ((0, H - hidden), (0, 0)))
    b2_p = b2.reshape(1, -1)

    if compute_dtype is not None:
        w1_p = w1_p.astype(compute_dtype)
        w2_p = w2_p.astype(compute_dtype)
        # biases stay f32: added on the f32 accumulator inside the kernel.
    return w1_p, b1_p, w2_p, b2_p


def simples_forward_prepared(x, w1_p, b1_p, w2_p, b2_p, *, block_b=4096,
                             compute_dtype=None):
    """Forward with pre-padded params from prepare_simples_params()."""
    B, in_features = x.shape
    H = w1_p.shape[1]
    out_features = w2_p.shape[1]
    out_dtype = x.dtype

    if compute_dtype is not None:
        x = x.astype(compute_dtype)

    # Batch tile: multiple of 8 (sublane), capped near B for small batches.
    TB = _round_up(max(block_b, 8), 8)
    TB = min(TB, _round_up(B, 8))
    grid = (pl.cdiv(B, TB),)  # ragged final block handled by Pallas masking

    return pl.pallas_call(
        mlp_kernel,
        out_shape=jax.ShapeDtypeStruct((B, out_features), out_dtype),
        grid=grid,
        in_specs=[
            pl.BlockSpec((TB, in_features), lambda i: (i, 0)),   # x: batch-tiled
            pl.BlockSpec((in_features, H), lambda i: (0, 0)),    # w1: resident
            pl.BlockSpec((1, H), lambda i: (0, 0)),              # b1: resident
            pl.BlockSpec((H, out_features), lambda i: (0, 0)),   # w2: resident
            pl.BlockSpec((1, out_features), lambda i: (0, 0)),   # b2: resident
        ],
        out_specs=pl.BlockSpec((TB, out_features), lambda i: (i, 0)),
        compiler_params=pltpu.CompilerParams(
            dimension_semantics=("parallel",),  # shard batch tiles across TCs (v7x)
        ),
    )(x, w1_p, b1_p, w2_p, b2_p)


def simples_forward(x, w1, b1, w2, b2, *, block_b=4096, compute_dtype=None):
    """Convenience wrapper taking raw (unpadded) parameters."""
    w1_p, b1_p, w2_p, b2_p = prepare_simples_params(
        w1, b1, w2, b2, compute_dtype=compute_dtype)
    return simples_forward_prepared(
        x, w1_p, b1_p, w2_p, b2_p, block_b=block_b, compute_dtype=compute_dtype)


if __name__ == "__main__":
    input_size = 20
    escondida_size = 100
    saida_size = 2
    batch = 8

    key = jax.random.PRNGKey(0)
    kx, k1, kb1, k2, kb2 = jax.random.split(key, 5)

    # PyTorch-style uniform(-1/sqrt(fan_in), 1/sqrt(fan_in)) init.
    bound1 = 1.0 / (input_size ** 0.5)
    bound2 = 1.0 / (escondida_size ** 0.5)
    w1 = jax.random.uniform(k1, (input_size, escondida_size), jnp.float32, -bound1, bound1)
    b1 = jax.random.uniform(kb1, (escondida_size,), jnp.float32, -bound1, bound1)
    w2 = jax.random.uniform(k2, (escondida_size, saida_size), jnp.float32, -bound2, bound2)
    b2 = jax.random.uniform(kb2, (saida_size,), jnp.float32, -bound2, bound2)

    x = jax.random.normal(kx, (batch, input_size), jnp.float32)

    # Hoist parameter prep out of the per-call path, jit only the forward.
    w1_p, b1_p, w2_p, b2_p = prepare_simples_params(w1, b1, w2, b2)
    fwd = jax.jit(functools.partial(simples_forward_prepared, block_b=4096))
    out = fwd(x, w1_p, b1_p, w2_p, b2_p)
    out = jax.block_until_ready(out)

    # Reference check in plain JAX.
    ref = jnp.maximum(x @ w1 + b1, 0.0) @ w2 + b2
    assert out.shape == (batch, saida_size)
    assert jnp.allclose(out, ref, atol=1e-5, rtol=1e-5)

    print("KERNEL_OK")
</pallas_src>

<mosaic_0001>
module attributes {stable_mosaic.version = 11 : i64} {
  func.func @mlp_kernel(%arg0: i32, %arg1: memref<8x20xf32, #tpu.memory_space<vmem>>, %arg2: memref<20x128xf32, #tpu.memory_space<vmem>>, %arg3: memref<1x128xf32, #tpu.memory_space<vmem>>, %arg4: memref<128x2xf32, #tpu.memory_space<vmem>>, %arg5: memref<1x2xf32, #tpu.memory_space<vmem>>, %arg6: memref<8x2xf32, #tpu.memory_space<vmem>>) attributes {dimension_semantics = [#tpu.dimension_semantics<parallel>], iteration_bounds = array<i64: 1>, scalar_prefetch = 0 : i64, scratch_operands = 0 : i64, tpu.core_type = #tpu.core_type<tc>, window_params = [{transform_indices = @transform_0, window_bounds = array<i64: 8, 20>}, {pipeline_mode = #tpu.pipeline_mode<synchronous>, transform_indices = @transform_1, window_bounds = array<i64: 20, 128>}, {pipeline_mode = #tpu.pipeline_mode<synchronous>, transform_indices = @transform_2, window_bounds = array<i64: 1, 128>}, {pipeline_mode = #tpu.pipeline_mode<synchronous>, transform_indices = @transform_3, window_bounds = array<i64: 128, 2>}, {pipeline_mode = #tpu.pipeline_mode<synchronous>, transform_indices = @transform_4, window_bounds = array<i64: 1, 2>}, {transform_indices = @transform_5, window_bounds = array<i64: 8, 2>}]} {
    %c0 = arith.constant 0 : index
    %c0_0 = arith.constant 0 : index
    %0 = vector.load %arg1[%c0, %c0_0] : memref<8x20xf32, #tpu.memory_space<vmem>>, vector<8x20xf32>
    %c0_1 = arith.constant 0 : index
    %c0_2 = arith.constant 0 : index
    %1 = vector.load %arg2[%c0_1, %c0_2] : memref<20x128xf32, #tpu.memory_space<vmem>>, vector<20x128xf32>
    %cst = arith.constant dense<0.000000e+00> : vector<8x128xf32>
    %2 = tpu.matmul %0, %1, %cst {dimension_numbers = #tpu.dot_dimension_numbers<[1], [0], [0], [1], [0, 0, 1, 1], [], []>} : vector<8x20xf32>, vector<20x128xf32>, vector<8x128xf32> -> vector<8x128xf32>
    %c0_3 = arith.constant 0 : index
    %c0_4 = arith.constant 0 : index
    %3 = vector.load %arg3[%c0_3, %c0_4] : memref<1x128xf32, #tpu.memory_space<vmem>>, vector<1x128xf32>
    %4 = vector.broadcast %3 : vector<1x128xf32> to vector<8x128xf32>
    %5 = arith.addf %2, %4 : vector<8x128xf32>
    %cst_5 = arith.constant 0.000000e+00 : f32
    %6 = vector.broadcast %cst_5 : f32 to vector<8x128xf32>
    %7 = arith.maximumf %5, %6 : vector<8x128xf32>
    %c0_6 = arith.constant 0 : index
    %c0_7 = arith.constant 0 : index
    %8 = vector.load %arg4[%c0_6, %c0_7] : memref<128x2xf32, #tpu.memory_space<vmem>>, vector<128x2xf32>
    %cst_8 = arith.constant dense<0.000000e+00> : vector<8x2xf32>
    %9 = tpu.matmul %7, %8, %cst_8 {dimension_numbers = #tpu.dot_dimension_numbers<[1], [0], [0], [1], [0, 0, 1, 1], [], []>} : vector<8x128xf32>, vector<128x2xf32>, vector<8x2xf32> -> vector<8x2xf32>
    %c0_9 = arith.constant 0 : index
    %c0_10 = arith.constant 0 : index
    %10 = vector.load %arg5[%c0_9, %c0_10] : memref<1x2xf32, #tpu.memory_space<vmem>>, vector<1x2xf32>
    %11 = vector.broadcast %10 : vector<1x2xf32> to vector<8x2xf32>
    %12 = arith.addf %9, %11 : vector<8x2xf32>
    %c0_11 = arith.constant 0 : index
    %c0_12 = arith.constant 0 : index
    %13 = vector.load %arg6[%c0_11, %c0_12] : memref<8x2xf32, #tpu.memory_space<vmem>>, vector<8x2xf32>
    tpu.vector_store %arg6[%c0_11, %c0_12], %12 {strides = array<i32>} : memref<8x2xf32, #tpu.memory_space<vmem>>, vector<8x2xf32>,
    return
  }
  func.func @transform_0(%arg0: i32) -> (i32, i32) {
    %c0_i32 = arith.constant 0 : i32
    %c0_i32_0 = arith.constant 0 : i32
    return %arg0, %c0_i32 : i32, i32
  }
  func.func @transform_1(%arg0: i32) -> (i32, i32) {
    %c0_i32 = arith.constant 0 : i32
    %c0_i32_0 = arith.constant 0 : i32
    %c0_i32_1 = arith.constant 0 : i32
    return %c0_i32, %c0_i32_0 : i32, i32
  }
  func.func @transform_2(%arg0: i32) -> (i32, i32) {
    %c0_i32 = arith.constant 0 : i32
    %c0_i32_0 = arith.constant 0 : i32
    %c0_i32_1 = arith.constant 0 : i32
    return %c0_i32, %c0_i32_0 : i32, i32
  }
  func.func @transform_3(%arg0: i32) -> (i32, i32) {
    %c0_i32 = arith.constant 0 : i32
    %c0_i32_0 = arith.constant 0 : i32
    %c0_i32_1 = arith.constant 0 : i32
    return %c0_i32, %c0_i32_0 : i32, i32
  }
  func.func @transform_4(%arg0: i32) -> (i32, i32) {
    %c0_i32 = arith.constant 0 : i32
    %c0_i32_0 = arith.constant 0 : i32
    %c0_i32_1 = arith.constant 0 : i32
    return %c0_i32, %c0_i32_0 : i32, i32
  }
  func.func @transform_5(%arg0: i32) -> (i32, i32) {
    %c0_i32 = arith.constant 0 : i32
    %c0_i32_0 = arith.constant 0 : i32
    return %arg0, %c0_i32 : i32, i32
  }
}

</mosaic_0001>

<bundles_post_ra>
// kernel: simples_forward_prepared.1
= control target key start
LH: loop header
LB: loop body
LE: loop exit
PB: predicated region body
PF: predicated region fallthrough
CT: control target
= control target key end

     0   :  { %v308_v0 = vmov 0.0|0.0   ;;  %vm309_vm0 = vmmov 0   ;;  %v310_v3 = vmov 0.0   ;;  %vm35_vm1 = vcmask 1043456   ;;  %s410_s1 = inlined_call_operand.vmem [shape: f32[20,128], index: 1, kind: input, shape index: {}]   ;;  %s411_s3 = inlined_call_operand.vmem [shape: f32[128,2], index: 3, kind: input, shape index: {}]   ;;  %s412_s0 = inlined_call_operand.vmem [shape: f32[8,20], index: 0, kind: input, shape index: {}]   ;;  %s413_s2 = inlined_call_operand.vmem [shape: f32[1,128], index: 2, kind: input, shape index: {}]   ;;  %s414_s4 = inlined_call_operand.vmem [shape: f32[1,2], index: 4, kind: input, shape index: {}]   ;;  %s415_s5 = inlined_call_operand.vmem [shape: f32[8,2], index: 5, kind: output, shape index: {}]  }
   0x1   :  { %278 = vmatprep.subr.bf16.mxu0 %v308_v0  ;;  %v21_v1 = vld [vmem:[%s410_s1] sm:$0xff]  ;;  %v22_v2 = vld [vmem:[%s410_s1 + $0x8] sm:$0xff]  ;;  %240 = vmatprep.mubr.msk.f32.mxu0 %vm309_vm0, %v310_v3  ;;  %v112_v8 = vld [vmem:[%s411_s3 + $0x10] sm:$0xff]  ;;  %vm31_vm2 = vcmask 162816   ;;  %vm203_vm3 = vcmask 15360  }
   0x2   :  { %v279_v4 = vpack.c.bf16 %v22_v2, %v21_v1  ;;  %281 = vmatprep.subr.bf16.mxu1 %v308_v0  ;;  %v110_v5 = vld [vmem:[%s411_s3] sm:$0xff]  ;;  %v111_v6 = vld [vmem:[%s411_s3 + $0x8] sm:$0xff]  ;;  %275 = vmatprep.mubr.msk.f32.mxu1 %vm309_vm0, %v310_v3  ;;  %v113_v9 = vld [vmem:[%s411_s3 + $0x18] sm:$0xff] }
   0x3   :  { %v282_v7 = vpack.c.bf16 %v111_v6, %v110_v5  ;;  %v23_v10 = vld [vmem:[%s410_s1 + $0x10] sm:$0xf]  ;;  %v285_v11 = vpack.c.bf16 %v113_v9, %v112_v8  ;;  %v20_v12 = vld [vmem:[%s412_s0] sm:$0xff]  ;;  %v115_v14 = vld [vmem:[%s411_s3 + $0x28] sm:$0xff] }
   0x4   :  { %280 = vmatpush3.bf16.msra.mxu0 %v279_v4  ;;  %v114_v13 = vld [vmem:[%s411_s3 + $0x20] sm:$0xff]  ;;  %v116_v16 = vld [vmem:[%s411_s3 + $0x30] sm:$0xff]  ;;  %v117_v17 = vld [vmem:[%s411_s3 + $0x38] sm:$0xff] }
   0x5   :  { %238 = vmatprep.subr.mxu0 %v310_v3  ;;  %283 = vmatpush3.bf16.msra.mxu1 %v282_v7  ;;  %v288_v15 = vpack.c.bf16 %v115_v14, %v114_v13  ;;  %v291_v18 = vpack.c.bf16 %v117_v17, %v116_v16  ;;  %v118_v19 = vld [vmem:[%s411_s3 + $0x40] sm:$0xff]  ;;  %v119_v20 = vld [vmem:[%s411_s3 + $0x48] sm:$0xff]  ;;  %v120_v22 = vld [vmem:[%s411_s3 + $0x50] sm:$0xff] }
   0x6   :  { %284 = vmatprep.subr.bf16.mxu1 %v308_v0  ;;  %v294_v21 = vpack.c.bf16 %v119_v20, %v118_v19  ;;  %v121_v23 = vld [vmem:[%s411_s3 + $0x58] sm:$0xff]  ;;  %v122_v25 = vld [vmem:[%s411_s3 + $0x60] sm:$0xff]  ;;  %v123_v26 = vld [vmem:[%s411_s3 + $0x68] sm:$0xff] }
   0x7   :  { %v297_v24 = vpack.c.bf16 %v121_v23, %v120_v22  ;;  %v300_v27 = vpack.c.bf16 %v123_v26, %v122_v25  ;;  %v124_v28 = vld [vmem:[%s411_s3 + $0x70] sm:$0xff]  ;;  %v125_v29 = vld [vmem:[%s411_s3 + $0x78] sm:$0xff]  ;;  %v209_v31 = vld [vmem:[%s413_s2] ss:$0 sm:$0xff] }
   0x8   :  { %239 = vmatpush3.msk.msra.mxu0 %vm35_vm1, %v23_v10  ;;  %v303_v30 = vpack.c.bf16 %v125_v29, %v124_v28  ;;  %v212_v36 = vld [vmem:[%s414_s4] ss:$0 sm:$0xff] }
   0x9   :  { %241 = vmatmul.mubr.msk.f32.vlgmr.msra.gmra.mrb[0].mxu0 %vm31_vm2, %v20_v12  ;;  %286 = vmatpush3.bf16.msra.mxu1 %v285_v11 }
   0xa   :  { %287 = vmatprep.subr.bf16.mxu1 %v308_v0 }
   0xd   :  { %289 = vmatpush3.bf16.msra.mxu1 %v288_v15 }
   0xe   :  { %290 = vmatprep.subr.bf16.mxu1 %v308_v0 }
  0x11   :  { %292 = vmatpush3.bf16.msra.mxu1 %v291_v18 }
  0x12   :  { %293 = vmatprep.subr.bf16.mxu1 %v308_v0 }
  0x15   :  { %295 = vmatpush3.bf16.msra.mxu1 %v294_v21 }
  0x16   :  { %296 = vmatprep.subr.bf16.mxu1 %v308_v0 }
  0x19   :  { %298 = vmatpush3.bf16.msra.mxu1 %v297_v24 }
  0x1a   :  { %299 = vmatprep.subr.bf16.mxu1 %v308_v0 }
  0x1d   :  { %301 = vmatpush3.bf16.msra.mxu1 %v300_v27 }
  0x1e   :  { %302 = vmatprep.subr.bf16.mxu1 %v308_v0 }
  0x21   :  { %304 = vmatpush3.bf16.msra.mxu1 %v303_v30 }
  0xdc   :  { %v105_v32 = vpop.f32.mrb[0].mxu0 }
  0xdd   :  { %v106_v33 = vadd.f32 %v209_v31, %v105_v32  ;;  %v242_v34 = vpop.f32.mrb[1].mxu0 }
  0xdf   :  { %v109_v35 = vmax.f32 %v106_v33, 0.0 }
  0xe1   :  { %276 = vmatmul.mubr.f32.vlgmr.msra.gmra.mrb[0].mxu1 %v109_v35 }
 0x1b4   :  { %v199_v37 = vpop.f32.mrb[0].mxu1 }
 0x1b5   :  { %v200_v38 = vadd.f32 %v212_v36, %v199_v37  ;;  %v277_v39 = vpop.f32.mrb[1].mxu1 }
 0x1b7   :  { %204 = vst.msk [vmem:[%s415_s5] sm:$0xff] %vm203_vm3, %v200_v38 }

</bundles_post_ra>
